<compile_context>
chip_gen: v6e
topology: v6e:2x2x1
jax: 0.10.0
libtpu: 0.0.40
codegen_flags: <defaults>
</compile_context>

<pallas_src>
import math
import functools

import jax
import jax.numpy as jnp
from jax.experimental import pallas as pl
from jax.experimental.pallas import tpu as pltpu


# ----------------------------------------------------------------------------
# Pallas kernel: one grid step = (one batch element, one encoder layer)
# ----------------------------------------------------------------------------
def _layer_norm(h, gamma, beta, eps=1e-5):
    mu = jnp.mean(h, axis=-1, keepdims=True)
    var = jnp.mean((h - mu) ** 2, axis=-1, keepdims=True)
    return (h - mu) * jax.lax.rsqrt(var + eps) * gamma + beta


def fused_encoder_kernel(pe_ref, x_ref,
                         wqkv_ref, bqkv_ref, wo_ref, bo_ref,
                         g1_ref, be1_ref, w1_ref, b1_ref, w2_ref, b2_ref,
                         g2_ref, be2_ref,
                         o_ref,
                         h_ref,
                         *, num_heads, d_query, d_key, d_value):
    S, D = pe_ref.shape
    H = num_heads
    d_k, d_kh, d_vh = d_query // H, d_key // H, d_value // H
    l = pl.program_id(1)

    # First layer: fold positional-encoding add into the kernel (dropout = id).
    @pl.when(l == 0)
    def _():
        h_ref[...] = x_ref[0] + pe_ref[...]

    h = h_ref[...]                                   # (S, D) f32, VMEM-resident
    hb = h.astype(jnp.bfloat16)

    # ---- fused Q|K|V projection: one MXU-shaped 2-D matmul --------------------
    # wqkv packed as [Q | K | V] blocks (each H*d_head wide -> lane-aligned at
    # realistic dims); 1/sqrt(d_k) already folded into the Q block.
    qkv = jnp.dot(hb, wqkv_ref[0],
                  preferred_element_type=jnp.float32) + bqkv_ref[0]   # (S, F)

    q = jnp.transpose(qkv[:, :d_query].reshape(S, H, d_k),
                      (1, 0, 2)).astype(jnp.bfloat16)                 # (H, S, d_k)
    k = jnp.transpose(qkv[:, d_query:d_query + d_key].reshape(S, H, d_kh),
                      (1, 0, 2)).astype(jnp.bfloat16)                 # (H, S, d_kh)
    v = jnp.transpose(qkv[:, d_query + d_key:].reshape(S, H, d_vh),
                      (1, 0, 2)).astype(jnp.bfloat16)                 # (H, S, d_vh)

    # ---- scaled-dot-product attention (scale pre-folded) ----------------------
    scores = jax.lax.dot_general(
        q, k, dimension_numbers=(((2,), (2,)), ((0,), (0,))),
        preferred_element_type=jnp.float32)                           # (H, S, S)
    scores = scores - jnp.max(scores, axis=-1, keepdims=True)
    p = jnp.exp(scores)
    p = p / jnp.sum(p, axis=-1, keepdims=True)        # exact softmax (f32)

    ctx = jax.lax.dot_general(
        p.astype(jnp.bfloat16), v,
        dimension_numbers=(((2,), (1,)), ((0,), (0,))),
        preferred_element_type=jnp.float32)                           # (H, S, d_vh)

    # combine_heads + W_o as ONE matmul: (S, H*d_vh) @ (H*d_vh, D)
    ctx2d = jnp.transpose(ctx, (1, 0, 2)).reshape(S, H * d_vh)
    attn = jnp.dot(ctx2d.astype(jnp.bfloat16), wo_ref[0],
                   preferred_element_type=jnp.float32) + bo_ref[0]    # (S, D)

    x1 = _layer_norm(h + attn, g1_ref[0], be1_ref[0])

    # ---- position-wise feed forward -------------------------------------------
    h1 = jnp.dot(x1.astype(jnp.bfloat16), w1_ref[0],
                 preferred_element_type=jnp.float32) + b1_ref[0]
    h1 = jnp.maximum(h1, 0.0)
    ff = jnp.dot(h1.astype(jnp.bfloat16), w2_ref[0],
                 preferred_element_type=jnp.float32) + b2_ref[0]

    h_new = _layer_norm(x1 + ff, g2_ref[0], be2_ref[0])
    h_ref[...] = h_new

    @pl.when(l == pl.num_programs(1) - 1)
    def _():
        o_ref[0] = h_new.astype(o_ref.dtype)


# ----------------------------------------------------------------------------
# Wrapper: grid = (batch, layer); layer axis streams per-layer weights
# ----------------------------------------------------------------------------
def transformer_encoder(src, pe, packed, *, num_layers, num_heads,
                        d_query, d_key, d_value):
    B, S, D = src.shape
    names = ["wqkv", "bqkv", "wo", "bo", "g1", "be1",
             "w1", "b1", "w2", "b2", "g2", "be2"]
    weights = [packed[n] for n in names]

    def layer_spec(w):
        nd = w.ndim
        block = (1,) + w.shape[1:]
        return pl.BlockSpec(block, lambda b, l, _nd=nd: (l,) + (0,) * (_nd - 1))

    kernel = functools.partial(
        fused_encoder_kernel, num_heads=num_heads,
        d_query=d_query, d_key=d_key, d_value=d_value)

    # TODO(synk): at scale, give the PE spec pipeline_mode=pl.Buffered(1)
    # (its block index is constant over the grid, so a single buffer suffices).
    in_specs = [pl.BlockSpec((S, D), lambda b, l: (0, 0)),          # PE
                pl.BlockSpec((1, S, D), lambda b, l: (b, 0, 0))]    # activations
    in_specs += [layer_spec(w) for w in weights]                    # per-layer wts

    return pl.pallas_call(
        kernel,
        out_shape=jax.ShapeDtypeStruct((B, S, D), src.dtype),
        grid=(B, num_layers),
        in_specs=in_specs,
        out_specs=pl.BlockSpec((1, S, D), lambda b, l: (b, 0, 0)),
        scratch_shapes=[pltpu.VMEM((S, D), jnp.float32)],   # carried activation
        compiler_params=pltpu.CompilerParams(
            dimension_semantics=("parallel", "arbitrary"),
            # one bf16 layer, double-buffered, plus activations/scratch;
            # re-derive per generation (v7x: 64 MiB/TC physical).
            vmem_limit_bytes=64 * 1024 * 1024),
    )(pe[:S], src, *weights)


# ----------------------------------------------------------------------------
# Host-side parameter construction & packing
# ----------------------------------------------------------------------------
def init_linear(key, d_in, d_out):
    kw, kb = jax.random.split(key)
    bound = 1.0 / math.sqrt(d_in)
    # stored as (in, out) so the kernel computes x @ W + b
    w = jax.random.uniform(kw, (d_in, d_out), jnp.float32, -bound, bound)
    b = jax.random.uniform(kb, (1, d_out), jnp.float32, -bound, bound)
    return w, b


def init_layer_params(key, d_model, d_query, d_key, d_value, d_ff):
    ks = jax.random.split(key, 6)
    wq, bq = init_linear(ks[0], d_model, d_query)
    wk, bk = init_linear(ks[1], d_model, d_key)
    wv, bv = init_linear(ks[2], d_model, d_value)
    wo, bo = init_linear(ks[3], d_value, d_model)
    w1, b1 = init_linear(ks[4], d_model, d_ff)
    w2, b2 = init_linear(ks[5], d_ff, d_model)
    return dict(
        wq=wq, bq=bq, wk=wk, bk=bk, wv=wv, bv=bv, wo=wo, bo=bo,
        w1=w1, b1=b1, w2=w2, b2=b2,
        g1=jnp.ones((1, d_model), jnp.float32),
        be1=jnp.zeros((1, d_model), jnp.float32),
        g2=jnp.ones((1, d_model), jnp.float32),
        be2=jnp.zeros((1, d_model), jnp.float32),
    )


def pack_layer_params(p, attn_scale):
    """Fuse [Q|K|V] along the output axis, fold 1/sqrt(d_k) into Q, cast matmul
    weights to bf16 (biases / LN params stay f32)."""
    wqkv = jnp.concatenate([p["wq"] * attn_scale, p["wk"], p["wv"]], axis=-1)
    bqkv = jnp.concatenate([p["bq"] * attn_scale, p["bk"], p["bv"]], axis=-1)
    return dict(
        wqkv=wqkv.astype(jnp.bfloat16), bqkv=bqkv,
        wo=p["wo"].astype(jnp.bfloat16), bo=p["bo"],
        w1=p["w1"].astype(jnp.bfloat16), b1=p["b1"],
        w2=p["w2"].astype(jnp.bfloat16), b2=p["b2"],
        g1=p["g1"], be1=p["be1"], g2=p["g2"], be2=p["be2"],
    )


def stack_layers(packed_layers):
    return {k: jnp.stack([layer[k] for layer in packed_layers])
            for k in packed_layers[0]}


def make_positional_encoding(d_model, max_seq_length):
    position = jnp.arange(max_seq_length, dtype=jnp.float32)[:, None]
    div_term = jnp.exp(jnp.arange(0, d_model, 2, dtype=jnp.float32)
                       * -(math.log(10000.0) / d_model))
    pe = jnp.zeros((max_seq_length, d_model), jnp.float32)
    pe = pe.at[:, 0::2].set(jnp.sin(position * div_term))
    pe = pe.at[:, 1::2].set(jnp.cos(position * div_term))
    return pe


# ----------------------------------------------------------------------------
if __name__ == "__main__":
    # Small shapes consistent with the module's forward.
    B, S = 2, 8
    d_model, d_query, d_key, d_value = 32, 32, 32, 32
    d_ff, num_heads, num_layers, max_seq_length = 64, 4, 2, 16
    # dropout = 0.1 -> identity in eval mode

    root = jax.random.PRNGKey(0)
    k_src, k_layers = jax.random.split(root)

    src = jax.random.normal(k_src, (B, S, d_model), jnp.float32)
    pe = make_positional_encoding(d_model, max_seq_length)

    layer_keys = jax.random.split(k_layers, num_layers)
    raw_layers = [init_layer_params(k, d_model, d_query, d_key, d_value, d_ff)
                  for k in layer_keys]
    attn_scale = 1.0 / math.sqrt(d_query // num_heads)
    packed = stack_layers([pack_layer_params(p, attn_scale)
                           for p in raw_layers])

    out = transformer_encoder(src, pe, packed,
                              num_layers=num_layers, num_heads=num_heads,
                              d_query=d_query, d_key=d_key, d_value=d_value)
    jax.block_until_ready(out)
    assert out.shape == (B, S, d_model)
    assert bool(jnp.all(jnp.isfinite(out)))
    print("KERNEL_OK")
</pallas_src>

<mosaic_0001>
module attributes {stable_mosaic.version = 11 : i64} {
  func.func @fused_encoder_kernel(%arg0: i32, %arg1: i32, %arg2: memref<8x32xf32, #tpu.memory_space<vmem>>, %arg3: memref<1x8x32xf32, #tpu.memory_space<vmem>>, %arg4: memref<1x32x96xbf16, #tpu.memory_space<vmem>>, %arg5: memref<1x1x96xf32, #tpu.memory_space<vmem>>, %arg6: memref<1x32x32xbf16, #tpu.memory_space<vmem>>, %arg7: memref<1x1x32xf32, #tpu.memory_space<vmem>>, %arg8: memref<1x1x32xf32, #tpu.memory_space<vmem>>, %arg9: memref<1x1x32xf32, #tpu.memory_space<vmem>>, %arg10: memref<1x32x64xbf16, #tpu.memory_space<vmem>>, %arg11: memref<1x1x64xf32, #tpu.memory_space<vmem>>, %arg12: memref<1x64x32xbf16, #tpu.memory_space<vmem>>, %arg13: memref<1x1x32xf32, #tpu.memory_space<vmem>>, %arg14: memref<1x1x32xf32, #tpu.memory_space<vmem>>, %arg15: memref<1x1x32xf32, #tpu.memory_space<vmem>>, %arg16: memref<1x8x32xf32, #tpu.memory_space<vmem>>, %arg17: memref<8x32xf32, #tpu.memory_space<vmem>>) attributes {dimension_semantics = [#tpu.dimension_semantics<parallel>, #tpu.dimension_semantics<arbitrary>], iteration_bounds = array<i64: 2, 2>, scalar_prefetch = 0 : i64, scratch_operands = 1 : i64, tpu.core_type = #tpu.core_type<tc>, window_params = [{pipeline_mode = #tpu.pipeline_mode<synchronous>, transform_indices = @transform_0, window_bounds = array<i64: 8, 32>}, {transform_indices = @transform_1, window_bounds = array<i64: 1, 8, 32>}, {transform_indices = @transform_2, window_bounds = array<i64: 1, 32, 96>}, {transform_indices = @transform_3, window_bounds = array<i64: 1, 1, 96>}, {transform_indices = @transform_4, window_bounds = array<i64: 1, 32, 32>}, {transform_indices = @transform_5, window_bounds = array<i64: 1, 1, 32>}, {transform_indices = @transform_6, window_bounds = array<i64: 1, 1, 32>}, {transform_indices = @transform_7, window_bounds = array<i64: 1, 1, 32>}, {transform_indices = @transform_8, window_bounds = array<i64: 1, 32, 64>}, {transform_indices = @transform_9, window_bounds = array<i64: 1, 1, 64>}, {transform_indices = @transform_10, window_bounds = array<i64: 1, 64, 32>}, {transform_indices = @transform_11, window_bounds = array<i64: 1, 1, 32>}, {transform_indices = @transform_12, window_bounds = array<i64: 1, 1, 32>}, {transform_indices = @transform_13, window_bounds = array<i64: 1, 1, 32>}, {transform_indices = @transform_14, window_bounds = array<i64: 1, 8, 32>}]} {
    %c0_i32 = arith.constant 0 : i32
    %0 = arith.cmpi eq, %arg1, %c0_i32 : i32
    %1 = arith.extui %0 : i1 to i32
    %c0_i32_0 = arith.constant 0 : i32
    %2 = arith.cmpi ne, %1, %c0_i32_0 : i32
    scf.if %2 {
      %c0_59 = arith.constant 0 : index
      %c0_60 = arith.constant 0 : index
      %c0_61 = arith.constant 0 : index
      %122 = vector.load %arg3[%c0_59, %c0_60, %c0_61] : memref<1x8x32xf32, #tpu.memory_space<vmem>>, vector<1x8x32xf32>
      %123 = vector.shape_cast %122 : vector<1x8x32xf32> to vector<8x32xf32>
      %c0_62 = arith.constant 0 : index
      %c0_63 = arith.constant 0 : index
      %124 = vector.load %arg2[%c0_62, %c0_63] : memref<8x32xf32, #tpu.memory_space<vmem>>, vector<8x32xf32>
      %125 = arith.addf %123, %124 : vector<8x32xf32>
      %c0_64 = arith.constant 0 : index
      %c0_65 = arith.constant 0 : index
      %126 = vector.load %arg17[%c0_64, %c0_65] : memref<8x32xf32, #tpu.memory_space<vmem>>, vector<8x32xf32>
      tpu.vector_store %arg17[%c0_64, %c0_65], %125 {strides = array<i32>} : memref<8x32xf32, #tpu.memory_space<vmem>>, vector<8x32xf32>,
    } else {
    }
    %c0 = arith.constant 0 : index
    %c0_1 = arith.constant 0 : index
    %3 = vector.load %arg17[%c0, %c0_1] : memref<8x32xf32, #tpu.memory_space<vmem>>, vector<8x32xf32>
    %4 = arith.truncf %3 : vector<8x32xf32> to vector<8x32xbf16>
    %c0_2 = arith.constant 0 : index
    %c0_3 = arith.constant 0 : index
    %c0_4 = arith.constant 0 : index
    %5 = vector.load %arg4[%c0_2, %c0_3, %c0_4] : memref<1x32x96xbf16, #tpu.memory_space<vmem>>, vector<1x32x96xbf16>
    %6 = vector.shape_cast %5 : vector<1x32x96xbf16> to vector<32x96xbf16>
    %cst = arith.constant dense<0.000000e+00> : vector<8x96xf32>
    %7 = tpu.matmul %4, %6, %cst {dimension_numbers = #tpu.dot_dimension_numbers<[1], [0], [0], [1], [0, 0, 1, 1], [], []>} : vector<8x32xbf16>, vector<32x96xbf16>, vector<8x96xf32> -> vector<8x96xf32>
    %c0_5 = arith.constant 0 : index
    %c0_6 = arith.constant 0 : index
    %c0_7 = arith.constant 0 : index
    %8 = vector.load %arg5[%c0_5, %c0_6, %c0_7] : memref<1x1x96xf32, #tpu.memory_space<vmem>>, vector<1x1x96xf32>
    %9 = vector.shape_cast %8 : vector<1x1x96xf32> to vector<1x96xf32>
    %10 = vector.broadcast %9 : vector<1x96xf32> to vector<8x96xf32>
    %11 = arith.addf %7, %10 : vector<8x96xf32>
    %12 = vector.extract_strided_slice %11 {offsets = [0, 0], sizes = [8, 32], strides = [1, 1]} : vector<8x96xf32> to vector<8x32xf32>
    %13 = vector.shape_cast %12 : vector<8x32xf32> to vector<8x4x8xf32>
    %14 = tpu.transpose %13, [1, 0, 2] : vector<8x4x8xf32> -> vector<4x8x8xf32>
    %15 = arith.truncf %14 : vector<4x8x8xf32> to vector<4x8x8xbf16>
    %16 = vector.extract_strided_slice %11 {offsets = [0, 32], sizes = [8, 32], strides = [1, 1]} : vector<8x96xf32> to vector<8x32xf32>
    %17 = vector.shape_cast %16 : vector<8x32xf32> to vector<8x4x8xf32>
    %18 = tpu.transpose %17, [1, 0, 2] : vector<8x4x8xf32> -> vector<4x8x8xf32>
    %19 = arith.truncf %18 : vector<4x8x8xf32> to vector<4x8x8xbf16>
    %20 = vector.extract_strided_slice %11 {offsets = [0, 64], sizes = [8, 32], strides = [1, 1]} : vector<8x96xf32> to vector<8x32xf32>
    %21 = vector.shape_cast %20 : vector<8x32xf32> to vector<8x4x8xf32>
    %22 = tpu.transpose %21, [1, 0, 2] : vector<8x4x8xf32> -> vector<4x8x8xf32>
    %23 = arith.truncf %22 : vector<4x8x8xf32> to vector<4x8x8xbf16>
    %cst_8 = arith.constant dense<0.000000e+00> : vector<4x8x8xf32>
    %24 = tpu.matmul %15, %19, %cst_8 {dimension_numbers = #tpu.dot_dimension_numbers<[2], [2], [1], [1], [0, 0, 0, 1, 1, 1], [0], [0]>} : vector<4x8x8xbf16>, vector<4x8x8xbf16>, vector<4x8x8xf32> -> vector<4x8x8xf32>
    %cst_9 = arith.constant dense<0xFF800000> : vector<4x8xf32>
    %25 = vector.multi_reduction <maximumf>, %24, %cst_9 [2] : vector<4x8x8xf32> to vector<4x8xf32>
    %26 = vector.shape_cast %25 : vector<4x8xf32> to vector<4x8x1xf32>
    %27 = vector.broadcast %26 : vector<4x8x1xf32> to vector<4x8x8xf32>
    %28 = arith.subf %24, %27 : vector<4x8x8xf32>
    %29 = math.exp %28 : vector<4x8x8xf32>
    %cst_10 = arith.constant dense<0.000000e+00> : vector<4x8xf32>
    %30 = vector.multi_reduction <add>, %29, %cst_10 [2] : vector<4x8x8xf32> to vector<4x8xf32>
    %31 = vector.shape_cast %30 : vector<4x8xf32> to vector<4x8x1xf32>
    %32 = vector.broadcast %31 : vector<4x8x1xf32> to vector<4x8x8xf32>
    %33 = arith.divf %29, %32 : vector<4x8x8xf32>
    %34 = arith.truncf %33 : vector<4x8x8xf32> to vector<4x8x8xbf16>
    %cst_11 = arith.constant dense<0.000000e+00> : vector<4x8x8xf32>
    %35 = tpu.matmul %34, %23, %cst_11 {dimension_numbers = #tpu.dot_dimension_numbers<[2], [1], [1], [2], [0, 0, 0, 1, 1, 2], [0], [0]>} : vector<4x8x8xbf16>, vector<4x8x8xbf16>, vector<4x8x8xf32> -> vector<4x8x8xf32>
    %36 = tpu.transpose %35, [1, 0, 2] : vector<4x8x8xf32> -> vector<8x4x8xf32>
    %37 = vector.shape_cast %36 : vector<8x4x8xf32> to vector<8x32xf32>
    %38 = arith.truncf %37 : vector<8x32xf32> to vector<8x32xbf16>
    %c0_12 = arith.constant 0 : index
    %c0_13 = arith.constant 0 : index
    %c0_14 = arith.constant 0 : index
    %39 = vector.load %arg6[%c0_12, %c0_13, %c0_14] : memref<1x32x32xbf16, #tpu.memory_space<vmem>>, vector<1x32x32xbf16>
    %40 = vector.shape_cast %39 : vector<1x32x32xbf16> to vector<32x32xbf16>
    %cst_15 = arith.constant dense<0.000000e+00> : vector<8x32xf32>
    %41 = tpu.matmul %38, %40, %cst_15 {dimension_numbers = #tpu.dot_dimension_numbers<[1], [0], [0], [1], [0, 0, 1, 1], [], []>} : vector<8x32xbf16>, vector<32x32xbf16>, vector<8x32xf32> -> vector<8x32xf32>
    %c0_16 = arith.constant 0 : index
    %c0_17 = arith.constant 0 : index
    %c0_18 = arith.constant 0 : index
    %42 = vector.load %arg7[%c0_16, %c0_17, %c0_18] : memref<1x1x32xf32, #tpu.memory_space<vmem>>, vector<1x1x32xf32>
    %43 = vector.shape_cast %42 : vector<1x1x32xf32> to vector<1x32xf32>
    %44 = vector.broadcast %43 : vector<1x32xf32> to vector<8x32xf32>
    %45 = arith.addf %41, %44 : vector<8x32xf32>
    %46 = arith.addf %3, %45 : vector<8x32xf32>
    %c0_19 = arith.constant 0 : index
    %c0_20 = arith.constant 0 : index
    %c0_21 = arith.constant 0 : index
    %47 = vector.load %arg8[%c0_19, %c0_20, %c0_21] : memref<1x1x32xf32, #tpu.memory_space<vmem>>, vector<1x1x32xf32>
    %48 = vector.shape_cast %47 : vector<1x1x32xf32> to vector<1x32xf32>
    %c0_22 = arith.constant 0 : index
    %c0_23 = arith.constant 0 : index
    %c0_24 = arith.constant 0 : index
    %49 = vector.load %arg9[%c0_22, %c0_23, %c0_24] : memref<1x1x32xf32, #tpu.memory_space<vmem>>, vector<1x1x32xf32>
    %50 = vector.shape_cast %49 : vector<1x1x32xf32> to vector<1x32xf32>
    %cst_25 = arith.constant dense<0.000000e+00> : vector<8xf32>
    %51 = vector.multi_reduction <add>, %46, %cst_25 [1] : vector<8x32xf32> to vector<8xf32>
    %52 = vector.shape_cast %51 : vector<8xf32> to vector<8x1xf32>
    %cst_26 = arith.constant 3.200000e+01 : f32
    %53 = vector.broadcast %cst_26 : f32 to vector<8x1xf32>
    %54 = arith.divf %52, %53 : vector<8x1xf32>
    %55 = vector.broadcast %54 : vector<8x1xf32> to vector<8x32xf32>
    %56 = arith.subf %46, %55 : vector<8x32xf32>
    %57 = arith.mulf %56, %56 : vector<8x32xf32>
    %cst_27 = arith.constant dense<0.000000e+00> : vector<8xf32>
    %58 = vector.multi_reduction <add>, %57, %cst_27 [1] : vector<8x32xf32> to vector<8xf32>
    %59 = vector.shape_cast %58 : vector<8xf32> to vector<8x1xf32>
    %cst_28 = arith.constant 3.200000e+01 : f32
    %60 = vector.broadcast %cst_28 : f32 to vector<8x1xf32>
    %61 = arith.divf %59, %60 : vector<8x1xf32>
    %62 = vector.broadcast %54 : vector<8x1xf32> to vector<8x32xf32>
    %63 = arith.subf %46, %62 : vector<8x32xf32>
    %cst_29 = arith.constant 9.99999974E-6 : f32
    %64 = vector.broadcast %cst_29 : f32 to vector<8x1xf32>
    %65 = arith.addf %61, %64 : vector<8x1xf32>
    %66 = math.rsqrt %65 : vector<8x1xf32>
    %67 = vector.broadcast %66 : vector<8x1xf32> to vector<8x32xf32>
    %68 = arith.mulf %63, %67 : vector<8x32xf32>
    %69 = vector.broadcast %48 : vector<1x32xf32> to vector<8x32xf32>
    %70 = arith.mulf %68, %69 : vector<8x32xf32>
    %71 = vector.broadcast %50 : vector<1x32xf32> to vector<8x32xf32>
    %72 = arith.addf %70, %71 : vector<8x32xf32>
    %73 = arith.truncf %72 : vector<8x32xf32> to vector<8x32xbf16>
    %c0_30 = arith.constant 0 : index
    %c0_31 = arith.constant 0 : index
    %c0_32 = arith.constant 0 : index
    %74 = vector.load %arg10[%c0_30, %c0_31, %c0_32] : memref<1x32x64xbf16, #tpu.memory_space<vmem>>, vector<1x32x64xbf16>
    %75 = vector.shape_cast %74 : vector<1x32x64xbf16> to vector<32x64xbf16>
    %cst_33 = arith.constant dense<0.000000e+00> : vector<8x64xf32>
    %76 = tpu.matmul %73, %75, %cst_33 {dimension_numbers = #tpu.dot_dimension_numbers<[1], [0], [0], [1], [0, 0, 1, 1], [], []>} : vector<8x32xbf16>, vector<32x64xbf16>, vector<8x64xf32> -> vector<8x64xf32>
    %c0_34 = arith.constant 0 : index
    %c0_35 = arith.constant 0 : index
    %c0_36 = arith.constant 0 : index
    %77 = vector.load %arg11[%c0_34, %c0_35, %c0_36] : memref<1x1x64xf32, #tpu.memory_space<vmem>>, vector<1x1x64xf32>
    %78 = vector.shape_cast %77 : vector<1x1x64xf32> to vector<1x64xf32>
    %79 = vector.broadcast %78 : vector<1x64xf32> to vector<8x64xf32>
    %80 = arith.addf %76, %79 : vector<8x64xf32>
    %cst_37 = arith.constant 0.000000e+00 : f32
    %81 = vector.broadcast %cst_37 : f32 to vector<8x64xf32>
    %82 = arith.maximumf %80, %81 : vector<8x64xf32>
    %83 = arith.truncf %82 : vector<8x64xf32> to vector<8x64xbf16>
    %c0_38 = arith.constant 0 : index
    %c0_39 = arith.constant 0 : index
    %c0_40 = arith.constant 0 : index
    %84 = vector.load %arg12[%c0_38, %c0_39, %c0_40] : memref<1x64x32xbf16, #tpu.memory_space<vmem>>, vector<1x64x32xbf16>
    %85 = vector.shape_cast %84 : vector<1x64x32xbf16> to vector<64x32xbf16>
    %cst_41 = arith.constant dense<0.000000e+00> : vector<8x32xf32>
    %86 = tpu.matmul %83, %85, %cst_41 {dimension_numbers = #tpu.dot_dimension_numbers<[1], [0], [0], [1], [0, 0, 1, 1], [], []>} : vector<8x64xbf16>, vector<64x32xbf16>, vector<8x32xf32> -> vector<8x32xf32>
    %c0_42 = arith.constant 0 : index
    %c0_43 = arith.constant 0 : index
    %c0_44 = arith.constant 0 : index
    %87 = vector.load %arg13[%c0_42, %c0_43, %c0_44] : memref<1x1x32xf32, #tpu.memory_space<vmem>>, vector<1x1x32xf32>
    %88 = vector.shape_cast %87 : vector<1x1x32xf32> to vector<1x32xf32>
    %89 = vector.broadcast %88 : vector<1x32xf32> to vector<8x32xf32>
    %90 = arith.addf %86, %89 : vector<8x32xf32>
    %91 = arith.addf %72, %90 : vector<8x32xf32>
    %c0_45 = arith.constant 0 : index
    %c0_46 = arith.constant 0 : index
    %c0_47 = arith.constant 0 : index
    %92 = vector.load %arg14[%c0_45, %c0_46, %c0_47] : memref<1x1x32xf32, #tpu.memory_space<vmem>>, vector<1x1x32xf32>
    %93 = vector.shape_cast %92 : vector<1x1x32xf32> to vector<1x32xf32>
    %c0_48 = arith.constant 0 : index
    %c0_49 = arith.constant 0 : index
    %c0_50 = arith.constant 0 : index
    %94 = vector.load %arg15[%c0_48, %c0_49, %c0_50] : memref<1x1x32xf32, #tpu.memory_space<vmem>>, vector<1x1x32xf32>
    %95 = vector.shape_cast %94 : vector<1x1x32xf32> to vector<1x32xf32>
    %cst_51 = arith.constant dense<0.000000e+00> : vector<8xf32>
    %96 = vector.multi_reduction <add>, %91, %cst_51 [1] : vector<8x32xf32> to vector<8xf32>
    %97 = vector.shape_cast %96 : vector<8xf32> to vector<8x1xf32>
    %cst_52 = arith.constant 3.200000e+01 : f32
    %98 = vector.broadcast %cst_52 : f32 to vector<8x1xf32>
    %99 = arith.divf %97, %98 : vector<8x1xf32>
    %100 = vector.broadcast %99 : vector<8x1xf32> to vector<8x32xf32>
    %101 = arith.subf %91, %100 : vector<8x32xf32>
    %102 = arith.mulf %101, %101 : vector<8x32xf32>
    %cst_53 = arith.constant dense<0.000000e+00> : vector<8xf32>
    %103 = vector.multi_reduction <add>, %102, %cst_53 [1] : vector<8x32xf32> to vector<8xf32>
    %104 = vector.shape_cast %103 : vector<8xf32> to vector<8x1xf32>
    %cst_54 = arith.constant 3.200000e+01 : f32
    %105 = vector.broadcast %cst_54 : f32 to vector<8x1xf32>
    %106 = arith.divf %104, %105 : vector<8x1xf32>
    %107 = vector.broadcast %99 : vector<8x1xf32> to vector<8x32xf32>
    %108 = arith.subf %91, %107 : vector<8x32xf32>
    %cst_55 = arith.constant 9.99999974E-6 : f32
    %109 = vector.broadcast %cst_55 : f32 to vector<8x1xf32>
    %110 = arith.addf %106, %109 : vector<8x1xf32>
    %111 = math.rsqrt %110 : vector<8x1xf32>
    %112 = vector.broadcast %111 : vector<8x1xf32> to vector<8x32xf32>
    %113 = arith.mulf %108, %112 : vector<8x32xf32>
    %114 = vector.broadcast %93 : vector<1x32xf32> to vector<8x32xf32>
    %115 = arith.mulf %113, %114 : vector<8x32xf32>
    %116 = vector.broadcast %95 : vector<1x32xf32> to vector<8x32xf32>
    %117 = arith.addf %115, %116 : vector<8x32xf32>
    %c0_56 = arith.constant 0 : index
    %c0_57 = arith.constant 0 : index
    %118 = vector.load %arg17[%c0_56, %c0_57] : memref<8x32xf32, #tpu.memory_space<vmem>>, vector<8x32xf32>
    tpu.vector_store %arg17[%c0_56, %c0_57], %117 {strides = array<i32>} : memref<8x32xf32, #tpu.memory_space<vmem>>, vector<8x32xf32>,
    %c1_i32 = arith.constant 1 : i32
    %119 = arith.cmpi eq, %arg1, %c1_i32 : i32
    %120 = arith.extui %119 : i1 to i32
    %c0_i32_58 = arith.constant 0 : i32
    %121 = arith.cmpi ne, %120, %c0_i32_58 : i32
    scf.if %121 {
      %c0_59 = arith.constant 0 : index
      %c0_60 = arith.constant 0 : index
      %c0_61 = arith.constant 0 : index
      %122 = vector.load %arg16[%c0_59, %c0_60, %c0_61] : memref<1x8x32xf32, #tpu.memory_space<vmem>>, vector<1x8x32xf32>
      %123 = vector.shape_cast %122 : vector<1x8x32xf32> to vector<8x32xf32>
      %124 = vector.shape_cast %117 : vector<8x32xf32> to vector<1x8x32xf32>
      tpu.vector_store %arg16[%c0_59, %c0_60, %c0_61], %124 {strides = array<i32>} : memref<1x8x32xf32, #tpu.memory_space<vmem>>, vector<1x8x32xf32>,
    } else {
    }
    return
  }
  func.func @transform_0(%arg0: i32, %arg1: i32) -> (i32, i32) {
    %c0_i32 = arith.constant 0 : i32
    %c0_i32_0 = arith.constant 0 : i32
    %c0_i32_1 = arith.constant 0 : i32
    return %c0_i32, %c0_i32_0 : i32, i32
  }
  func.func @transform_1(%arg0: i32, %arg1: i32) -> (i32, i32, i32) {
    %c0_i32 = arith.constant 0 : i32
    %c0_i32_0 = arith.constant 0 : i32
    %c0_i32_1 = arith.constant 0 : i32
    return %arg0, %c0_i32, %c0_i32_0 : i32, i32, i32
  }
  func.func @transform_2(%arg0: i32, %arg1: i32) -> (i32, i32, i32) {
    %c0_i32 = arith.constant 0 : i32
    %c0_i32_0 = arith.constant 0 : i32
    %c0_i32_1 = arith.constant 0 : i32
    return %arg1, %c0_i32, %c0_i32_0 : i32, i32, i32
  }
  func.func @transform_3(%arg0: i32, %arg1: i32) -> (i32, i32, i32) {
    %c0_i32 = arith.constant 0 : i32
    %c0_i32_0 = arith.constant 0 : i32
    %c0_i32_1 = arith.constant 0 : i32
    return %arg1, %c0_i32, %c0_i32_0 : i32, i32, i32
  }
  func.func @transform_4(%arg0: i32, %arg1: i32) -> (i32, i32, i32) {
    %c0_i32 = arith.constant 0 : i32
    %c0_i32_0 = arith.constant 0 : i32
    %c0_i32_1 = arith.constant 0 : i32
    return %arg1, %c0_i32, %c0_i32_0 : i32, i32, i32
  }
  func.func @transform_5(%arg0: i32, %arg1: i32) -> (i32, i32, i32) {
    %c0_i32 = arith.constant 0 : i32
    %c0_i32_0 = arith.constant 0 : i32
    %c0_i32_1 = arith.constant 0 : i32
    return %arg1, %c0_i32, %c0_i32_0 : i32, i32, i32
  }
  func.func @transform_6(%arg0: i32, %arg1: i32) -> (i32, i32, i32) {
    %c0_i32 = arith.constant 0 : i32
    %c0_i32_0 = arith.constant 0 : i32
    %c0_i32_1 = arith.constant 0 : i32
    return %arg1, %c0_i32, %c0_i32_0 : i32, i32, i32
  }
  func.func @transform_7(%arg0: i32, %arg1: i32) -> (i32, i32, i32) {
    %c0_i32 = arith.constant 0 : i32
    %c0_i32_0 = arith.constant 0 : i32
    %c0_i32_1 = arith.constant 0 : i32
    return %arg1, %c0_i32, %c0_i32_0 : i32, i32, i32
  }
  func.func @transform_8(%arg0: i32, %arg1: i32) -> (i32, i32, i32) {
    %c0_i32 = arith.constant 0 : i32
    %c0_i32_0 = arith.constant 0 : i32
    %c0_i32_1 = arith.constant 0 : i32
    return %arg1, %c0_i32, %c0_i32_0 : i32, i32, i32
  }
  func.func @transform_9(%arg0: i32, %arg1: i32) -> (i32, i32, i32) {
    %c0_i32 = arith.constant 0 : i32
    %c0_i32_0 = arith.constant 0 : i32
    %c0_i32_1 = arith.constant 0 : i32
    return %arg1, %c0_i32, %c0_i32_0 : i32, i32, i32
  }
  func.func @transform_10(%arg0: i32, %arg1: i32) -> (i32, i32, i32) {
    %c0_i32 = arith.constant 0 : i32
    %c0_i32_0 = arith.constant 0 : i32
    %c0_i32_1 = arith.constant 0 : i32
    return %arg1, %c0_i32, %c0_i32_0 : i32, i32, i32
  }
  func.func @transform_11(%arg0: i32, %arg1: i32) -> (i32, i32, i32) {
    %c0_i32 = arith.constant 0 : i32
    %c0_i32_0 = arith.constant 0 : i32
    %c0_i32_1 = arith.constant 0 : i32
    return %arg1, %c0_i32, %c0_i32_0 : i32, i32, i32
  }
  func.func @transform_12(%arg0: i32, %arg1: i32) -> (i32, i32, i32) {
    %c0_i32 = arith.constant 0 : i32
    %c0_i32_0 = arith.constant 0 : i32
    %c0_i32_1 = arith.constant 0 : i32
    return %arg1, %c0_i32, %c0_i32_0 : i32, i32, i32
  }
  func.func @transform_13(%arg0: i32, %arg1: i32) -> (i32, i32, i32) {
    %c0_i32 = arith.constant 0 : i32
    %c0_i32_0 = arith.constant 0 : i32
    %c0_i32_1 = arith.constant 0 : i32
    return %arg1, %c0_i32, %c0_i32_0 : i32, i32, i32
  }
  func.func @transform_14(%arg0: i32, %arg1: i32) -> (i32, i32, i32) {
    %c0_i32 = arith.constant 0 : i32
    %c0_i32_0 = arith.constant 0 : i32
    %c0_i32_1 = arith.constant 0 : i32
    return %arg0, %c0_i32, %c0_i32_0 : i32, i32, i32
  }
}

</mosaic_0001>

<bundles_post_ra>
// kernel: tpu_custom_call.1
= control target key start
LH: loop header
LB: loop body
LE: loop exit
PB: predicated region body
PF: predicated region fallthrough
CT: control target
= control target key end

     0   :  { %s3350_s0 = inlined_call_operand.hbm [shape: f32[8,32], index: 0, kind: input, shape index: {}]   ;;  %s3351_s1 = inlined_call_operand.hbm [shape: f32[2,8,32], index: 1, kind: input, shape index: {}]   ;;  %s3352_s2 = inlined_call_operand.vmem [shape: bf16[2,32,96], index: 2, kind: input, shape index: {}]   ;;  %s3353_s3 = inlined_call_operand.vmem [shape: f32[2,1,96], index: 3, kind: input, shape index: {}]   ;;  %s3354_s4 = inlined_call_operand.vmem [shape: bf16[2,32,32], index: 4, kind: input, shape index: {}]   ;;  %s3355_s5 = inlined_call_operand.vmem [shape: f32[2,1,32], index: 5, kind: input, shape index: {}]   ;;  %s3356_s6 = inlined_call_operand.vmem [shape: f32[2,1,32], index: 6, kind: input, shape index: {}]   ;;  %s3357_s7 = inlined_call_operand.vmem [shape: f32[2,1,32], index: 7, kind: input, shape index: {}]   ;;  %s3358_s8 = inlined_call_operand.vmem [shape: bf16[2,32,64], index: 8, kind: input, shape index: {}]   ;;  %s3359_s9 = inlined_call_operand.vmem [shape: f32[2,1,64], index: 9, kind: input, shape index: {}]   ;;  %s3360_s10 = inlined_call_operand.vmem [shape: bf16[2,64,32], index: 10, kind: input, shape index: {}]   ;;  %s3361_s11 = inlined_call_operand.vmem [shape: f32[2,1,32], index: 11, kind: input, shape index: {}]   ;;  %s3362_s12 = inlined_call_operand.vmem [shape: f32[2,1,32], index: 12, kind: input, shape index: {}]   ;;  %s3363_s13 = inlined_call_operand.vmem [shape: f32[2,1,32], index: 13, kind: input, shape index: {}]   ;;  %s3364_s14 = inlined_call_operand.hbm [shape: f32[2,8,32], index: 14, kind: output, shape index: {}]  }
   0x1   :  { %3379 = sst [smem:[#allocation25_spill]] %s3350_s0 }
   0x2   :  { %3380 = sst [smem:[#allocation26_spill]] %s3351_s1 }
   0x3   :  { %3381 = sst [smem:[#allocation27_spill]] %s3352_s2 }
   0x4   :  { %3382 = sst [smem:[#allocation28_spill]] %s3354_s4 }
   0x5   :  { %3383 = sst [smem:[#allocation29_spill]] %s3357_s7 }
   0x6   :  { %3384 = sst [smem:[#allocation30_spill]] %s3358_s8 }
   0x7   :  { %3385 = sst [smem:[#allocation31_spill]] %s3360_s10 }
   0x8   :  { %3386 = sst [smem:[#allocation32_spill]] %s3361_s11 }
   0x9   :  { %3387 = sst [smem:[#allocation33_spill]] %s3362_s12 }
   0xa   :  { %3388 = sst [smem:[#allocation34_spill]] %s3363_s13 }
   0xb   :  { %3389 = sst [smem:[#allocation35_spill]] %s3364_s14 }
   0xc   :  { %19 = vsyncpa [#allocation4], 0 }
   0xd   :  { %20 = vsyncpa [#allocation7], 0 }
   0xe   :  { %22 = vsyncpa [#allocation7 + $0x1], 0 }
   0xf   :  { %23 = vsyncpa [#allocation5], 0 }
  0x10   :  { %25 = vsyncpa [#allocation5 + $0x1], 0  ;;  %s2875_s29 = smov 0   ;;  %s2877_s30 = smov 0  }
  0x11   :  { %s2879_s15 = smov 0   ;;  %s2881_s16 = smov 0  }
  0x12   :  { %s2883_s17 = smov 0   ;;  %s2885_s18 = smov 0  }
  0x13   :  { %s2887_s19 = smov 0   ;;  %s2889_s20 = smov 0  }
  0x14 LB: > { %3390 = sst [smem:[#allocation12_spill]] %s2755_s29  ;;  %s2317_s21 = sadd.s32 4294967295, %s2783_s20   ;;  %s2783_s20 = sphi %s2889_s20, %s31_s20   ;;  %s2779_s19 = sphi %s2887_s19, %s3443_s19   ;;  %s2775_s18 = sphi %s2885_s18, %s3442_s18   ;;  %s2771_s17 = sphi %s2883_s17, %s3441_s17   ;;  %s2767_s16 = sphi %s2881_s16, %s3440_s16   ;;  %s2763_s15 = sphi %s2879_s15, %s3439_s15   ;;  %s2759_s30 = sphi %s2877_s30, %s3438_s30   ;;  %s2755_s29 = sphi %s2875_s29, %s3437_s29  }
  0x15   : > { %3391 = sst [smem:[#allocation13_spill]] %s2759_s30  ;;  %s2318_s22 = sadd.s32 4294967294, %s2783_s20  }
  0x16   : > { %3392 = sst [smem:[#allocation14_spill]] %s2763_s15  ;;  %p84_p0 = scmp.ne.s32.totalorder %s2759_s30, %s2755_s29 }
  0x17   : > { %3393 = sst [smem:[#allocation15_spill]] %s2771_s17  ;;  %p2919_p1 = scmp.eq.s32.totalorder %s2317_s21, 0 }
  0x18   : > { %3394 = sst [smem:[#allocation16_spill]] %s2775_s18  ;;  %p2923_p2 = scmp.eq.s32.totalorder %s2317_s21, 3 }
  0x19   : > { %3395 = sst [smem:[#allocation17_spill]] %s2779_s19  ;;  %p426_p3 = scmp.eq.s32.totalorder %s2318_s22, 3 }
  0x1a   : > { %3396 = sst [smem:[#allocation18_spill]] %s2783_s20  ;;  %p2929_p4 = por %p2919_p1, %p84_p0 }
  0x1b   : > { %p2319_p5 = scmp.ge.s32.totalorder %s2783_s20, 1  ;;  %p2934_p6 = por %p426_p3, %p84_p0 }
  0x1c   : > { %p433_p7 = scmp.lt.s32.totalorder %s2783_s20, 5  ;;  %s2785_s28 = smov [#allocation3]  }
  0x1d   : > { %s3400_s26 = scalar_select %p2934_p6, 1, 0 }
  0x1e   : > { %p2939_p8 = pnand %p2319_p5, %p433_p7  ;;  %s446_s21 = sshll.u32 %s2785_s28, 4  ;;  %s447_s21 = int_to_ptr.vmem [resolvable:$true] %s446_s21 }
  0x1f   : > { %3401 = sst [smem:[#allocation19_spill]] %s3400_s26  ;;  %s40_s22 = sadd.s32 1, %s2775_s18 }
  0x20   : > { %p2506_p9 = pneg %p2939_p8  ;;  %s2640_s29 = scalar_lea.vmem %s447_s21, 128 }
  0x21   : > { %p2641_p12 = scmp.ne.s32.totalorder %s447_s21, %s2640_s29  ;;  %p2648_p3 = scmp.lt.s32.totalorder %s447_s21, %s447_s21 }
  0x22   : > { %p2507_p10 = pnand %p2506_p9, %p2919_p1  ;;  %p2649_p6 = scmp.lt.s32.totalorder %s2640_s29, %s2640_s29 }
  0x24   : > { %p2631_p11 = pneg %p2507_p10  ;;  %p2650_p5 = por %p2649_p6, %p2648_p3 }
  0x26   : > { %p2643_p13 = pnand %p2641_p12, %p2631_p11 }
  0x28   : > { %p2644_p0 = pneg %p2643_p13 }
  0x2a   : > { %p2651_p7 = pnand %p2650_p5, %p2644_p0 }
  0x2c   : > { %2654 = shalt.err (!%p2651_p7)
}
  0x2d   : > { %s3403_s0 = sld [smem:[#allocation25_spill]]  ;;  %p41_p9 = scmp.ge.s32.totalorder %s40_s22, 2 }
  0x2e   : > { %s43_s29 = sadd.s32 1, %s2779_s19  ;;  %s71_s28 = sadd.s32 1, %s2763_s15 }
  0x2f   : > { %p78_p6 = scmp.ne.s32.totalorder %s2763_s15, %s2759_s30  ;;  %s3445_s22 = smov (%p41_p9, %s40_s22), 0 }
  0x30   : > { %3404 = sst [smem:[#allocation20_spill]] %s3445_s22  ;;  %s3447_s29 = smov (!%p41_p9, %s43_s29), %s2779_s19 }
  0x31   : > { %p79_p11 = scmp.eq.s32.totalorder %s2783_s20, 0  ;;  %p2961_p12 = por %p2923_p2, %p78_p6 }
  0x32   : > { %p45_p13 = scmp.ge.s32.totalorder %s3447_s29, 2  ;;  %p2519_p0 = scmp.lt.s32.totalorder %s2783_s20, 4 }
  0x33   : > { %2509 = dma.hbm_to_vmem [thread:$0]  (!%p2507_p10), %s3403_s0, 128, %s447_s21, [#allocation4]  }
  0x34   : > { %s3405_s14 = scalar_select %p2961_p12, 1, 0 }
  0x35   : > { %p80_p3 = por %p79_p11, %p78_p6  ;;  %s457_s26 = sand.u32 1, %s2763_s15  }
  0x36   : > { %3406 = sst [smem:[#allocation21_spill]] %s3405_s14  ;;  %s3449_s29 = smov (%p45_p13, %s3447_s29), 0 }
  0x37   : > { %3407 = sst [smem:[#allocation22_spill]] %s3449_s29  ;;  %s2322_s21 = sshll.u32 %s457_s26, 3 }
  0x38   : > { %s68_s0 = ssub.s32 %s2779_s19, %s3449_s29  ;;  %s2323_s22 = sshll.u32 %s2779_s19, 7 }
  0x39   : > { %p69_p10 = scmp.eq.s32.totalorder %s68_s0, 0  ;;  %s3408_s1 = sld [smem:[#allocation26_spill]] }
  0x3a   : > { %s461_s13 = scalar_lea.vmem [#allocation6], %s2322_s21  ;;  %p2980_p2 = pnand %p2519_p0, %p80_p3 }
  0x3b   : > { %s468_s12 = sshll.u32 %s461_s13, 4  ;;  %s458_s10 = scalar_lea.sflag [#allocation7], %s457_s26  ;;  %s469_s12 = int_to_ptr.vmem [resolvable:$true] %s468_s12 }
  0x3c   : > { %s2976_s11 = scalar_select %p69_p10, %s2763_s15, %s71_s28  }
  0x3d   : > { %p2657_p5 = pneg %p2980_p2  ;;  %s2668_s0 = scalar_lea.vmem %s469_s12, 128 }
  0x3e   : > { %3409 = sst [smem:[#allocation23_spill]] %s2976_s11  ;;  %p2669_p7 = scmp.ne.s32.totalorder %s469_s12, %s2668_s0 }
  0x3f   : > { %s466_s24 = scalar_lea.hbm %s3408_s1, %s2323_s22  ;;  %s2786_s17 = smov [#allocation6]  }
  0x40   : > { %p2671_p9 = pnand %p2669_p7, %p2657_p5  ;;  %s2673_s18 = sshll.u32 %s2786_s17, 4  ;;  %s2674_s18 = int_to_ptr.vmem [resolvable:$false] %s2673_s18 }
  0x41   : > { %s2675_s13 = scalar_lea.vmem %s2674_s18, 256  ;;  %p2676_p11 = scmp.lt.s32.totalorder %s469_s12, %s2674_s18 }
  0x42   : > { %p2672_p6 = pneg %p2671_p9  ;;  %p2677_p13 = scmp.lt.s32.totalorder %s2675_s13, %s2668_s0 }
  0x44   : > { %p2678_p10 = por %p2677_p13, %p2676_p11 }
  0x46   : > { %p2679_p12 = pnand %p2678_p10, %p2672_p6 }
  0x48   : > { %2682 = shalt.err (!%p2679_p12)
}
  0x49   : > { %2513 = dma.hbm_to_vmem [thread:$0]  (!%p2980_p2), %s466_s24, 128, %s469_s12, %s458_s10  }
  0x4a   : > { %557 = sbr.rel (%p2939_p8) target bundleno = 2705 (0xa91), region = 76 }
  0x4f   : > { %2742 = dma.done.wait (%p2919_p1), [#allocation4], 128  }
  0x50   : > { %2744 = vsyncadd (%p2919_p1), [#allocation4], 4294967168  ;;  %s2995_s22 = sand.u32 1, %s2759_s30  }
  0x51   : > { %3411 = sst [smem:[#allocation24_spill]] %s2995_s22  ;;  %s2326_s28 = sshll.u32 %s2995_s22, 3 }
  0x52   : > { %s564_s26 = scalar_lea.sflag [#allocation7], %s2995_s22  ;;  %s567_s21 = scalar_lea.vmem [#allocation6], %s2326_s28 }
  0x53   : > { %2746 = dma.done.wait (%p2929_p4), %s564_s26, 128  }
  0x54   : > { %2748 = vsyncadd (%p2929_p4), %s564_s26, 4294967168  ;;  %p656_p8 = scmp.lt.s32.totalorder %s2767_s16, 1  ;;  %s3412_s2 = sld [smem:[#allocation27_spill]] }
  0x55   : > { %s3413_s4 = sld [smem:[#allocation28_spill]]  ;;  %s3059_s17 = scalar_lea.vmem [#allocation8], %s2326_s28 }
  0x56   : > { %s3005_s10 = scalar_select %p656_p8, %s2767_s16, 1 }
  0x57   : > { %s3415_s8 = sld [smem:[#allocation30_spill]]  ;;  %p2336_p1 = scmp.ne.s32.totalorder %s2767_s16, 0 }
  0x58   : > { %s2380_s12 = sshll.u32 %s3005_s10, 4  ;;  %s3416_s29 = sld [smem:[#allocation31_spill]] }
  0x59   : > { %s3417_s15 = sld [smem:[#allocation32_spill]] }
  0x5a   : > { %s660_s0 = scalar_lea.vmem %s3412_s2, %s2380_s12  ;;  %s685_s2 = scalar_lea.vmem %s3359_s9, %s3005_s10 }
  0x5b   : > { %s3018_s13 = scalar_lea.vmem %s3413_s4, %s2380_s12  ;;  %s2383_s4 = sshll.u32 %s3005_s10, 5 }
  0x5c   : > { %s3418_s22 = sld [smem:[#allocation33_spill]] }
  0x5d   : > { %s3035_s24 = scalar_lea.vmem %s3415_s8, %s2380_s12  ;;  %s3419_s8 = sld [smem:[#allocation34_spill]] }
  0x5e   : > { %s3045_s20 = scalar_lea.vmem %s3416_s29, %s2383_s4 }
  0x5f   : > { %s693_s30 = scalar_lea.vmem %s3417_s15, %s3005_s10  ;;  %704 = sbr.rel (%p2336_p1) target bundleno = 104 (0x68), region = 88 }
  0x62   : > { %s696_s25 = scalar_lea.vmem %s3418_s22, %s3005_s10 }
  0x63   : > { %s699_s7 = scalar_lea.vmem %s3419_s8, %s3005_s10 }
  0x64   : > { %v705_v0 = vld [vmem:[%s567_s21] sm:$0xff]  ;;  %v706_v1 = vld [vmem:[#allocation3] sm:$0xff]  ;;  %vm708_vm0 = vcmask 261120  }
  0x65   : > { %v707_v2 = vadd.f32 %v706_v1, %v705_v0 }
  0x67   : > { %709 = vst.msk [vmem:[#allocation2] sm:$0xff] %vm708_vm0, %v707_v2 }
  0x68 PF: > { %v2599_v3 = vld [vmem:[%s660_s0 + $0x8] sm:$0xff]   ;;  %v2787_v4 = vmov 0.0   ;;  %v2600_v5 = vld [vmem:[%s660_s0] sm:$0xff]   ;;  %vm2788_vm1 = vmmov 0   ;;  %vm735_vm2 = vcmask 261120   ;;  %s3420_s15 = scalar_lea.vmem %s3353_s3, %s3005_s10  ;;  %s2789_s29 = smov 104   ;;  %v794_v19 = vlaneseq }
  0x69   : > { %2414 = vmatprep.subr.bf16.mxu0 %v2787_v4  ;;  %2422 = vmatprep.subr.bf16.mxu1 %v2787_v4  ;;  %v2337_v8 = vld [vmem:[%s3420_s15] ss:$0 sm:$0xff]  ;;  %s2790_s22 = smov 120   ;;  %s2791_s28 = smov 96   ;;  %v2793_v17 = vmov 1983009808  }
  0x6a   : > { %2415 = vmatpush3.bf16.msra.mxu0 %v2599_v3  ;;  %2418 = vmatprep.mubr.msk.bf16.mxu0 %vm2788_vm1, %v2787_v4  ;;  %s2792_s21 = smov 112   ;;  %v792_v18 = vunpack.c.l.s4 %v2793_v17  ;;  %v795_v21 = vshrl.u32 %v794_v19, 7  ;;  %v2794_v22 = vmov 1934713408   ;;  %vm1233_vm3 = vcmask 64512   ;;  %s2795_s0 = smov 64  }
  0x6b   : > { %2416 = vmatprep.subr.bf16.mxu0 %v2787_v4  ;;  %2424 = vmatprep.mubr.msk.bf16.mxu1 %vm2788_vm1, %v2787_v4  ;;  %v824_v23 = vunpack.c.l.s4 %v2794_v22  ;;  %vm1469_vm4 = vcmask 1043456   ;;  %s2797_s27 = smov 8   ;;  %s2798_s18 = smov 24   ;;  %vm1800_vm5 = vcmask 130048   ;;  %vm1802_vm6 = vcmask 195584  }
  0x6c   : > { %v793_v20 = vunpack.c.0.s8 %v792_v18  ;;  %s3421_s11 = scalar_lea.vmem %s3355_s5, %s3005_s10  ;;  %s3422_s23 = scalar_lea.vmem %s3356_s6, %s3005_s10  ;;  %vm2010_vm7 = vcmask 523264  }
  0x6d   : > { %v825_v29 = vunpack.c.0.s8 %v824_v23  ;;  %s3423_s4 = sld [smem:[#allocation29_spill]]  ;;  %p2375_p4 = scmp.ne.s32.totalorder %s2767_s16, 1 }
  0x6e   : > { %v3066_v6 = vld [vmem:[#allocation2] sm:$0xff]  ;;  %2417 = vmatpush3.bf16.msra.mxu0 %v2600_v5  ;;  %v3101_v26 = vsub.s32 %v793_v20, %v795_v21 }
  0x6f   : > { %v711_v7 = vpack.c.bf16 %v3066_v6, %v3066_v6  ;;  %2428 = vmatprep.subr.bf16.mxu0 %v2787_v4  ;;  %v3111_v36 = vsub.s32 %v825_v29, %v795_v21 }
  0x71   : > { %2419 = vmatmul.mubr.msk.bf16.vlgmr.msra.gmra.mxu0 %vm735_vm2, %v711_v7 }
  0x72   : > { %2430 = vmatprep.mubr.msk.bf16.mxu0 %vm2788_vm1, %v2787_v4 }
  0x73   : > { %s3424_s8 = scalar_lea.vmem %s3423_s4, %s3005_s10 }
 0x131   : > { %v773_v9 = vpop.f32.mrf.mxu0 }
 0x132   : > { %v3082_v10 = vadd.f32 %v2337_v8, %v773_v9 }
 0x133   : > { %v2420_v11 = vpop.f32.mrf.mxu0 }
 0x134   : > { %786 = vrot.lane.b32.xlu1 %v3082_v10, %s2789_s29  ;;  %780 = vrot.lane.b32.xlu0 %v3082_v10, %s2790_s22 }
 0x135   : > { %v776_v12 = vpop.f32.mrf.mxu0 }
 0x137   : > { %v2421_v13 = vpop.f32.mrf.mxu0 }
 0x138   : > { %929 = vrot.lane.b32.xlu1 %v3082_v10, %s2791_s28  ;;  %783 = vrot.lane.b32.xlu0 %v3082_v10, %s2792_s21 }
 0x1a6   : > { %v3088_v14 = vpop.permute.xlu0 %780  ;;  %v3091_v15 = vpop.permute.xlu1 %786 }
 0x1a7   : > { %931 = vrot.lane.b32.xlu0 %v3088_v14, %s2791_s28  ;;  %v805_v27 = vcombine.low %v3088_v14, %v3091_v15  ;;  %v806_v28 = vcombine.high %v3088_v14, %v3091_v15 }
 0x1a9   : > { %v813_v32 = vrot.slane %v805_v27, %v3101_v26  ;;  %v820_v33 = vrot.slane %v806_v28, %v3101_v26 }
 0x1aa   : > { %v3093_v16 = vpop.permute.xlu0 %783  ;;  %v930_v34 = vpop.permute.xlu1 %929 }
 0x1ab   : > { %935 = vrot.lane.b32.xlu0 %v3091_v15, %s2791_s28  ;;  %933 = vrot.lane.b32.xlu1 %v3093_v16, %s2791_s28  ;;  %v789_v24 = vcombine.low %v3082_v10, %v3093_v16  ;;  %v790_v25 = vcombine.high %v3082_v10, %v3093_v16 }
 0x1ad   : > { %v797_v30 = vrot.slane %v789_v24, %v3101_v26  ;;  %v804_v31 = vrot.slane %v790_v25, %v3101_v26 }
 0x1af   : > { %v821_v37 = vcombine.low %v797_v30, %v813_v32  ;;  %v822_v38 = vcombine.high %v797_v30, %v813_v32  ;;  %v837_v39 = vcombine.low %v804_v31, %v820_v33  ;;  %v838_v40 = vcombine.high %v804_v31, %v820_v33 }
 0x1b1   : > { %v829_v47 = vrot.slane %v821_v37, %v3111_v36  ;;  %v836_v48 = vrot.slane %v822_v38, %v3111_v36  ;;  %v845_v49 = vrot.slane %v837_v39, %v3111_v36  ;;  %v852_v50 = vrot.slane %v838_v40, %v3111_v36 }
 0x1b3   : > { %v857_v59 = vcombine.low %v829_v47, %v836_v48  ;;  %v2341_v60 = vcombine.high %v829_v47, %v836_v48  ;;  %v873_v61 = vcombine.low %v845_v49, %v852_v50  ;;  %v2342_v62 = vcombine.high %v845_v49, %v852_v50 }
 0x1b5   : > { %v864_v9 = vrot.slane %v857_v59, %v3101_v26  ;;  %v872_v11 = vrot.slane %v2341_v60, %v3101_v26  ;;  %v880_v12 = vrot.slane %v873_v61, %v3101_v26  ;;  %v888_v13 = vrot.slane %v2342_v62, %v3101_v26 }
 0x1b7   : > { %v889_v28 = vcombine.low %v864_v9, %v872_v11  ;;  %v905_v29 = vcombine.low %v880_v12, %v888_v13 }
 0x1b9   : > { %v897_v37 = vrot.slane %v889_v28, %v3111_v36  ;;  %v913_v38 = vrot.slane %v905_v29, %v3111_v36 }
 0x219   : > { %v932_v35 = vpop.permute.xlu0 %931 }
 0x21d   : > { %v934_v41 = vpop.permute.xlu1 %933  ;;  %v936_v42 = vpop.permute.xlu0 %935 }
 0x21e   : > { %v941_v43 = vcombine.low %v930_v34, %v934_v41  ;;  %v942_v44 = vcombine.high %v930_v34, %v934_v41  ;;  %v957_v45 = vcombine.low %v932_v35, %v936_v42  ;;  %v958_v46 = vcombine.high %v932_v35, %v936_v42 }
 0x220   : > { %v949_v51 = vrot.slane %v941_v43, %v3101_v26  ;;  %v956_v52 = vrot.slane %v942_v44, %v3101_v26  ;;  %v965_v53 = vrot.slane %v957_v45, %v3101_v26  ;;  %v972_v54 = vrot.slane %v958_v46, %v3101_v26 }
 0x221   : > { %v890_v43 = vcombine.high %v864_v9, %v872_v11  ;;  %v906_v44 = vcombine.high %v880_v12, %v888_v13  ;;  %v921_v45 = vcombine.low %v897_v37, %v913_v38  ;;  %v922_v46 = vcombine.high %v897_v37, %v913_v38 }
 0x222   : > { %v973_v55 = vcombine.low %v949_v51, %v965_v53  ;;  %v974_v56 = vcombine.high %v949_v51, %v965_v53  ;;  %v989_v57 = vcombine.low %v956_v52, %v972_v54  ;;  %v990_v58 = vcombine.high %v956_v52, %v972_v54 }
 0x223   : > { %v925_v49 = vpack.c.bf16 %v921_v45, %v921_v45  ;;  %v926_v50 = vpack.c.bf16 %v922_v46, %v922_v46  ;;  %v904_v51 = vrot.slane %v890_v43, %v3111_v36  ;;  %v920_v52 = vrot.slane %v906_v44, %v3111_v36 }
 0x224   : > { %v981_v63 = vrot.slane %v973_v55, %v3111_v36  ;;  %v988_v0 = vrot.slane %v974_v56, %v3111_v36  ;;  %v997_v1 = vrot.slane %v989_v57, %v3111_v36  ;;  %v1004_v2 = vrot.slane %v990_v58, %v3111_v36 }
 0x225   : > { %v923_v55 = vcombine.low %v904_v51, %v920_v52  ;;  %v924_v56 = vcombine.high %v904_v51, %v920_v52 }
 0x226   : > { %v1009_v3 = vcombine.low %v981_v63, %v988_v0  ;;  %v2343_v5 = vcombine.high %v981_v63, %v988_v0  ;;  %v1025_v7 = vcombine.low %v997_v1, %v1004_v2  ;;  %v2344_v8 = vcombine.high %v997_v1, %v1004_v2 }
 0x227   : > { %v927_v57 = vpack.c.bf16 %v923_v55, %v923_v55  ;;  %v928_v58 = vpack.c.bf16 %v924_v56, %v924_v56 }
 0x228   : > { %v1016_v17 = vrot.slane %v1009_v3, %v3101_v26  ;;  %v1024_v18 = vrot.slane %v2343_v5, %v3101_v26  ;;  %v1032_v19 = vrot.slane %v1025_v7, %v3101_v26  ;;  %v1040_v20 = vrot.slane %v2344_v8, %v3101_v26 }
 0x22a   : > { %v1041_v21 = vcombine.low %v1016_v17, %v1024_v18  ;;  %v1057_v22 = vcombine.low %v1032_v19, %v1040_v20  ;;  %v1042_v23 = vcombine.high %v1016_v17, %v1024_v18  ;;  %v1058_v24 = vcombine.high %v1032_v19, %v1040_v20 }
 0x22c   : > { %v1049_v25 = vrot.slane %v1041_v21, %v3111_v36  ;;  %v1065_v27 = vrot.slane %v1057_v22, %v3111_v36  ;;  %v1056_v32 = vrot.slane %v1042_v23, %v3111_v36  ;;  %v1072_v33 = vrot.slane %v1058_v24, %v3111_v36 }
 0x22e   : > { %v1073_v30 = vcombine.low %v1049_v25, %v1065_v27  ;;  %v1074_v31 = vcombine.high %v1049_v25, %v1065_v27  ;;  %v1075_v41 = vcombine.low %v1056_v32, %v1072_v33  ;;  %v1076_v42 = vcombine.high %v1056_v32, %v1072_v33 }
 0x230   : > { %v1077_v34 = vpack.c.bf16 %v1073_v30, %v1073_v30  ;;  %v1078_v35 = vpack.c.bf16 %v1074_v31, %v1074_v31  ;;  %v1079_v47 = vpack.c.bf16 %v1075_v41, %v1075_v41  ;;  %v1080_v48 = vpack.c.bf16 %v1076_v42, %v1076_v42 }
 0x232   : > { %v1238_v39 = vsel %vm1233_vm3, %v1077_v34, 0  ;;  %v1284_v40 = vsel %vm1233_vm3, %v1078_v35, 0  ;;  %v1330_v53 = vsel %vm1233_vm3, %v1079_v47, 0  ;;  %v1376_v54 = vsel %vm1233_vm3, %v1080_v48, 0 }
 0x233   : > { %2423 = vmatpush3.bf16.xpose.msra.mxu1 %v1238_v39  ;;  %2429 = vmatpush3.bf16.xpose.msra.mxu0 %v1284_v40 }
 0x234   : > { %2434 = vmatprep.subr.bf16.mxu1 %v2787_v4  ;;  %2440 = vmatprep.subr.bf16.mxu0 %v2787_v4 }
 0x23a   : > { %2425 = vmatmul.mubr.msk.bf16.vlgmr.msra.gmra.mxu1 %vm1233_vm3, %v925_v49  ;;  %2431 = vmatmul.mubr.msk.bf16.vlgmr.msra.gmra.mxu0 %vm1233_vm3, %v926_v50 }
 0x23b   : > { %2435 = vmatpush3.bf16.xpose.msra.mxu1 %v1330_v53  ;;  %2441 = vmatpush3.bf16.xpose.msra.mxu0 %v1376_v54 }
 0x23c   : > { %2436 = vmatprep.mubr.msk.bf16.mxu1 %vm2788_vm1, %v2787_v4  ;;  %2442 = vmatprep.mubr.msk.bf16.mxu0 %vm2788_vm1, %v2787_v4 }
 0x23d   : > { %2446 = vmatprep.subr.bf16.mxu1 %v2787_v4  ;;  %2452 = vmatprep.subr.bf16.mxu0 %v2787_v4 }
 0x242   : > { %2437 = vmatmul.mubr.msk.bf16.vlgmr.msra.gmra.mxu1 %vm1233_vm3, %v927_v57  ;;  %2443 = vmatmul.mubr.msk.bf16.vlgmr.msra.gmra.mxu0 %vm1233_vm3, %v928_v58 }
 0x243   : > { %2448 = vmatprep.mubr.msk.bf16.mxu1 %vm2788_vm1, %v2787_v4  ;;  %2454 = vmatprep.mubr.msk.bf16.mxu0 %vm2788_vm1, %v2787_v4 }
 0x2fa   : > { %v1274_v59 = vpop.f32.mrf.mxu1  ;;  %v1320_v60 = vpop.f32.mrf.mxu0 }
 0x2fb   : > { %v1418_v61 = vsel %vm1233_vm3, %v1274_v59, -inf  ;;  %v1421_v62 = vsel %vm1233_vm3, %v1320_v60, -inf }
 0x2fc   : > { %1419 = vmax.xlane.f32.xlu1 %v1418_v61  ;;  %v2426_v63 = vpop.f32.mrf.mxu1  ;;  %1422 = vmax.xlane.f32.xlu0 %v1421_v62  ;;  %v2432_v0 = vpop.f32.mrf.mxu0 }
 0x2fe   : > { %v1277_v1 = vpop.f32.mrf.mxu1  ;;  %v1323_v2 = vpop.f32.mrf.mxu0 }
 0x300   : > { %v2427_v3 = vpop.f32.mrf.mxu1  ;;  %v2433_v5 = vpop.f32.mrf.mxu0 }
 0x302   : > { %v1366_v7 = vpop.f32.mrf.mxu1  ;;  %v1412_v8 = vpop.f32.mrf.mxu0 }
 0x303   : > { %v1424_v9 = vsel %vm1233_vm3, %v1366_v7, -inf  ;;  %v1427_v11 = vsel %vm1233_vm3, %v1412_v8, -inf }
 0x304   : > { %v2438_v12 = vpop.f32.mrf.mxu1  ;;  %1425 = vmax.xlane.f32.xlu0 %v1424_v9  ;;  %1428 = vmax.xlane.f32.xlu1 %v1427_v11  ;;  %v2444_v13 = vpop.f32.mrf.mxu0 }
 0x306   : > { %v1369_v17 = vpop.f32.mrf.mxu1  ;;  %v1415_v18 = vpop.f32.mrf.mxu0 }
 0x308   : > { %v2439_v19 = vpop.f32.mrf.mxu1  ;;  %v2445_v20 = vpop.f32.mrf.mxu0 }
 0x315   : > { %1083 = vrot.lane.b32.xlu1 %v3088_v14, %s2795_s0 }
 0x31a   : > { %1081 = vrot.lane.b32.xlu0 %v3082_v10, %s2795_s0 }
 0x385   : > { %v1420_v21 = vpop.xlane.xlu1 %1419  ;;  %v1423_v22 = vpop.xlane.xlu0 %1422 }
 0x386   : > { %v1430_v23 = vsub.f32 %v1274_v59, %v1420_v21  ;;  %v1431_v24 = vsub.f32 %v1320_v60, %v1423_v22 }
 0x388   : > { %v1434_v25 = vmul.f32 1.442695, %v1430_v23  ;;  %v1436_v27 = vmul.f32 1.442695, %v1431_v24 }
 0x38a   : > { %2609 = vpow2.f32 %v1434_v25 }
 0x38b   : > { %2611 = vpow2.f32 %v1436_v27 }
 0x38d   : > { %v1429_v10 = vpop.xlane.xlu1 %1428  ;;  %v1426_v31 = vpop.xlane.xlu0 %1425 }
 0x38e   : > { %v1433_v32 = vsub.f32 %v1412_v8, %v1429_v10  ;;  %v1432_v33 = vsub.f32 %v1366_v7, %v1426_v31 }
 0x390   : > { %v1440_v34 = vmul.f32 1.442695, %v1433_v32  ;;  %v1438_v35 = vmul.f32 1.442695, %v1432_v33 }
 0x391   : > { %v1084_v40 = vpop.permute.xlu1 %1083 }
 0x392   : > { %2613 = vpow2.f32 %v1440_v34 }
 0x393   : > { %2615 = vpow2.f32 %v1438_v35 }
 0x397   : > { %v3167_v28 = vpop.eup %2609 }
 0x398   : > { %v3169_v29 = vpop.eup %2611  ;;  %v1442_v30 = vsel %vm1233_vm3, %v3167_v28, 0.0 }
 0x399   : > { %1443 = vadd.xlane.f32.xlu0 %v1442_v30  ;;  %v1445_v14 = vsel %vm1233_vm3, %v3169_v29, 0.0 }
 0x39a   : > { %1446 = vadd.xlane.f32.xlu1 %v1445_v14 }
 0x39f   : > { %v3177_v37 = vpop.eup %2613 }
 0x3a0   : > { %v3179_v38 = vpop.eup %2615  ;;  %v1451_v39 = vsel %vm1233_vm3, %v3177_v37, 0.0 }
 0x3ab   : > { %1085 = vrot.lane.b32.xlu1 %v3093_v16, %s2795_s0  ;;  %v1448_v16 = vsel %vm1233_vm3, %v3179_v38, 0.0 }
 0x3af   : > { %1087 = vrot.lane.b32.xlu0 %v3091_v15, %s2795_s0  ;;  %v1082_v15 = vpop.permute.xlu0 %1081 }
 0x3ce   : > { %1452 = vadd.xlane.f32.xlu0 %v1451_v39 }
 0x3cf   : > { %1449 = vadd.xlane.f32.xlu1 %v1448_v16 }
 0x422   : > { %v1444_v41 = vpop.xlane.xlu0 %1443 }
 0x423   : > { %v1447_v42 = vpop.xlane.xlu1 %1446  ;;  %2617 = vrcp.f32 %v1444_v41 }
 0x424   : > { %2619 = vrcp.f32 %v1447_v42 }
 0x426   : > { %v1088_v43 = vpop.permute.xlu0 %1087 }
 0x427   : > { %v1109_v44 = vcombine.low %v1084_v40, %v1088_v43  ;;  %v1110_v45 = vcombine.high %v1084_v40, %v1088_v43  ;;  %v1086_v46 = vpop.permute.xlu1 %1085 }
 0x428   : > { %v1093_v47 = vcombine.low %v1082_v15, %v1086_v46  ;;  %v1094_v48 = vcombine.high %v1082_v15, %v1086_v46 }
 0x429   : > { %v1117_v49 = vrot.slane %v1109_v44, %v3101_v26  ;;  %v1124_v50 = vrot.slane %v1110_v45, %v3101_v26 }
 0x42a   : > { %v1101_v51 = vrot.slane %v1093_v47, %v3101_v26  ;;  %v1108_v52 = vrot.slane %v1094_v48, %v3101_v26 }
 0x42c   : > { %v1125_v53 = vcombine.low %v1101_v51, %v1117_v49  ;;  %v1126_v54 = vcombine.high %v1101_v51, %v1117_v49  ;;  %v1141_v55 = vcombine.low %v1108_v52, %v1124_v50  ;;  %v1142_v56 = vcombine.high %v1108_v52, %v1124_v50 }
 0x42e   : > { %v1133_v57 = vrot.slane %v1125_v53, %v3111_v36  ;;  %v1140_v58 = vrot.slane %v1126_v54, %v3111_v36  ;;  %v1149_v59 = vrot.slane %v1141_v55, %v3111_v36  ;;  %v1156_v60 = vrot.slane %v1142_v56, %v3111_v36 }
 0x430   : > { %v1161_v61 = vcombine.low %v1133_v57, %v1140_v58  ;;  %v2345_v62 = vcombine.high %v1133_v57, %v1140_v58  ;;  %v1177_v63 = vcombine.low %v1149_v59, %v1156_v60  ;;  %v2346_v0 = vcombine.high %v1149_v59, %v1156_v60  ;;  %v2618_v12 = vpop.eup %2617 }
 0x431   : > { %v2620_v20 = vpop.eup %2619  ;;  %v1455_v30 = vmul.f32 %v2618_v12, %v3167_v28 }
 0x432   : > { %v1168_v1 = vrot.slane %v1161_v61, %v3101_v26  ;;  %v1176_v2 = vrot.slane %v2345_v62, %v3101_v26  ;;  %v1184_v3 = vrot.slane %v1177_v63, %v3101_v26  ;;  %v1192_v5 = vrot.slane %v2346_v0, %v3101_v26 }
 0x433   : > { %v1457_v14 = vmul.f32 %v2620_v20, %v3169_v29  ;;  %v1462_v34 = vpack.c.bf16 %v1455_v30, %v1455_v30 }
 0x434   : > { %v1193_v7 = vcombine.low %v1168_v1, %v1176_v2  ;;  %v1209_v8 = vcombine.low %v1184_v3, %v1192_v5  ;;  %v1194_v9 = vcombine.high %v1168_v1, %v1176_v2  ;;  %v1210_v11 = vcombine.high %v1184_v3, %v1192_v5 }
 0x435   : > { %v1463_v35 = vpack.c.bf16 %v1457_v14, %v1457_v14 }
 0x436   : > { %v1201_v13 = vrot.slane %v1193_v7, %v3111_v36  ;;  %v1217_v17 = vrot.slane %v1209_v8, %v3111_v36  ;;  %v1208_v18 = vrot.slane %v1194_v9, %v3111_v36  ;;  %v1224_v19 = vrot.slane %v1210_v11, %v3111_v36  ;;  %v2601_v8 = vld [vmem:[%s3018_s13 + $0x8] sm:$0xff]  }
 0x438   : > { %v1225_v21 = vcombine.low %v1201_v13, %v1217_v17  ;;  %v1226_v22 = vcombine.high %v1201_v13, %v1217_v17  ;;  %v1227_v23 = vcombine.low %v1208_v18, %v1224_v19  ;;  %v1228_v24 = vcombine.high %v1208_v18, %v1224_v19 }
 0x43a   : > { %v1229_v25 = vpack.c.bf16 %v1225_v21, %v1225_v21  ;;  %v1230_v27 = vpack.c.bf16 %v1226_v22, %v1226_v22  ;;  %v1231_v32 = vpack.c.bf16 %v1227_v23, %v1227_v23  ;;  %v1232_v33 = vpack.c.bf16 %v1228_v24, %v1228_v24  ;;  %v2602_v22 = vld [vmem:[%s3018_s13] sm:$0xff]   ;;  %s2796_s13 = smov 16  }
 0x43c   : > { %v1471_v10 = vsel %vm1469_vm4, %v1229_v25, 0  ;;  %v1517_v31 = vsel %vm1469_vm4, %v1230_v27, 0  ;;  %v1563_v28 = vsel %vm1469_vm4, %v1231_v32, 0  ;;  %v1609_v29 = vsel %vm1469_vm4, %v1232_v33, 0 }
 0x43d   : > { %2447 = vmatpush3.bf16.msra.mxu1 %v1471_v10  ;;  %2453 = vmatpush3.bf16.msra.mxu0 %v1517_v31 }
 0x43e   : > { %2458 = vmatprep.subr.bf16.mxu1 %v2787_v4  ;;  %2464 = vmatprep.subr.bf16.mxu0 %v2787_v4 }
 0x440   : > { %2449 = vmatmul.mubr.msk.bf16.vlgmr.msra.gmra.mxu1 %vm1233_vm3, %v1462_v34  ;;  %2455 = vmatmul.mubr.msk.bf16.vlgmr.msra.gmra.mxu0 %vm1233_vm3, %v1463_v35 }
 0x441   : > { %2459 = vmatpush3.bf16.msra.mxu1 %v1563_v28  ;;  %2465 = vmatpush3.bf16.msra.mxu0 %v1609_v29 }
 0x442   : > { %2460 = vmatprep.mubr.msk.bf16.mxu1 %vm2788_vm1, %v2787_v4  ;;  %2466 = vmatprep.mubr.msk.bf16.mxu0 %vm2788_vm1, %v2787_v4 }
 0x443   : > { %2470 = vmatprep.subr.bf16.mxu1 %v2787_v4  ;;  %2478 = vmatprep.subr.bf16.mxu0 %v2787_v4 }
 0x457   : > { %v1453_v39 = vpop.xlane.xlu0 %1452 }
 0x458   : > { %2621 = vrcp.f32 %v1453_v39  ;;  %v1450_v16 = vpop.xlane.xlu1 %1449 }
 0x459   : > { %2623 = vrcp.f32 %v1450_v16 }
 0x465   : > { %v2622_v15 = vpop.eup %2621 }
 0x466   : > { %v2624_v40 = vpop.eup %2623  ;;  %v1461_v41 = vmul.f32 %v2622_v15, %v3177_v37 }
 0x467   : > { %v1459_v42 = vmul.f32 %v2624_v40, %v3179_v38 }
 0x468   : > { %v1465_v43 = vpack.c.bf16 %v1461_v41, %v1461_v41 }
 0x469   : > { %v1464_v44 = vpack.c.bf16 %v1459_v42, %v1459_v42 }
 0x46a   : > { %2467 = vmatmul.mubr.msk.bf16.vlgmr.msra.gmra.mxu0 %vm1233_vm3, %v1465_v43 }
 0x46b   : > { %2461 = vmatmul.mubr.msk.bf16.vlgmr.msra.gmra.mxu1 %vm1233_vm3, %v1464_v44  ;;  %2482 = vmatprep.mubr.msk.bf16.mxu0 %vm2788_vm1, %v2787_v4  ;;  %v2357_v44 = vld [vmem:[%s3421_s11] ss:$0 sm:$0xff] }
 0x46c   : > { %2474 = vmatprep.mubr.msk.bf16.mxu1 %vm2788_vm1, %v2787_v4  ;;  %2471 = vmatpush3.bf16.msra.mxu1 %v2601_v8  ;;  %v2363_v8 = vld [vmem:[%s685_s2] ss:$0 sm:$0xff] }
 0x46d   : > { %2472 = vmatprep.subr.bf16.mxu1 %v2787_v4 }
 0x470   : > { %2473 = vmatpush3.bf16.msra.mxu1 %v2602_v22 }
 0x471   : > { %2486 = vmatprep.subr.bf16.mxu1 %v2787_v4 }
 0x500   : > { %v1507_v45 = vpop.f32.mrf.mxu1  ;;  %v1553_v46 = vpop.f32.mrf.mxu0 }
 0x502   : > { %v2450_v47 = vpop.f32.mrf.mxu1  ;;  %v2456_v48 = vpop.f32.mrf.mxu0 }
 0x504   : > { %v1510_v49 = vpop.f32.mrf.mxu1  ;;  %v1556_v37 = vpop.f32.mrf.mxu0 }
 0x506   : > { %v2451_v50 = vpop.f32.mrf.mxu1  ;;  %v2457_v38 = vpop.f32.mrf.mxu0 }
 0x52a   : > { %v1645_v51 = vpop.f32.mrf.mxu0 }
 0x52b   : > { %v1599_v52 = vpop.f32.mrf.mxu1  ;;  %v1667_v53 = vcombine.low %v1553_v46, %v1645_v51  ;;  %v1668_v54 = vcombine.high %v1553_v46, %v1645_v51 }
 0x52c   : > { %v1651_v55 = vcombine.low %v1507_v45, %v1599_v52  ;;  %v1652_v56 = vcombine.high %v1507_v45, %v1599_v52  ;;  %v2468_v57 = vpop.f32.mrf.mxu0 }
 0x52d   : > { %v1675_v58 = vrot.slane %v1667_v53, %v3101_v26  ;;  %v1682_v59 = vrot.slane %v1668_v54, %v3101_v26  ;;  %v2462_v60 = vpop.f32.mrf.mxu1  ;;  %v2606_v57 = vld [vmem:[%s3045_s20 + $0x10] sm:$0xff]  }
 0x52e   : > { %v1659_v61 = vrot.slane %v1651_v55, %v3101_v26  ;;  %v1666_v62 = vrot.slane %v1652_v56, %v3101_v26  ;;  %v1648_v63 = vpop.f32.mrf.mxu0  ;;  %v2603_v55 = vld [vmem:[%s3035_s24 + $0x8] sm:$0xff]   ;;  %v2604_v56 = vld [vmem:[%s3035_s24] sm:$0xff]  }
 0x52f   : > { %v1602_v0 = vpop.f32.mrf.mxu1  ;;  %2479 = vmatpush3.bf16.msra.mxu0 %v2603_v55 }
 0x530   : > { %v1683_v1 = vcombine.low %v1659_v61, %v1675_v58  ;;  %v1684_v2 = vcombine.high %v1659_v61, %v1675_v58  ;;  %v1699_v3 = vcombine.low %v1666_v62, %v1682_v59  ;;  %v1700_v5 = vcombine.high %v1666_v62, %v1682_v59  ;;  %v2469_v7 = vpop.f32.mrf.mxu0  ;;  %2480 = vmatprep.subr.bf16.mxu0 %v2787_v4  ;;  %v2361_v62 = vld [vmem:[%s3422_s23] ss:$0 sm:$0xff] }
 0x531   : > { %v2463_v9 = vpop.f32.mrf.mxu1  ;;  %v2362_v0 = vld [vmem:[%s3424_s8] ss:$0 sm:$0xff] }
 0x532   : > { %v1691_v11 = vrot.slane %v1683_v1, %v3111_v36  ;;  %v1698_v12 = vrot.slane %v1684_v2, %v3111_v36  ;;  %v1707_v13 = vrot.slane %v1699_v3, %v3111_v36  ;;  %v1714_v17 = vrot.slane %v1700_v5, %v3111_v36  ;;  %v2607_v5 = vld [vmem:[%s3045_s20 + $0x8] sm:$0xff]   ;;  %v2608_v7 = vld [vmem:[%s3045_s20] sm:$0xff]  }
 0x533   : > { %2481 = vmatpush3.bf16.msra.mxu0 %v2604_v56 }
 0x534   : > { %v1719_v18 = vcombine.low %v1691_v11, %v1698_v12  ;;  %v2355_v19 = vcombine.high %v1691_v11, %v1698_v12  ;;  %v1735_v20 = vcombine.low %v1707_v13, %v1714_v17  ;;  %v2356_v21 = vcombine.high %v1707_v13, %v1714_v17 }
 0x536   : > { %v1726_v23 = vrot.slane %v1719_v18, %v3101_v26  ;;  %v1734_v24 = vrot.slane %v2355_v19, %v3101_v26  ;;  %v1742_v25 = vrot.slane %v1735_v20, %v3101_v26  ;;  %v1750_v27 = vrot.slane %v2356_v21, %v3101_v26 }
 0x538   : > { %v1752_v30 = vcombine.high %v1726_v23, %v1734_v24  ;;  %v1768_v14 = vcombine.high %v1742_v25, %v1750_v27  ;;  %v1751_v10 = vcombine.low %v1726_v23, %v1734_v24  ;;  %v1767_v31 = vcombine.low %v1742_v25, %v1750_v27 }
 0x53a   : > { %v1766_v32 = vrot.slane %v1752_v30, %v3111_v36  ;;  %v1782_v33 = vrot.slane %v1768_v14, %v3111_v36  ;;  %v1759_v34 = vrot.slane %v1751_v10, %v3111_v36  ;;  %v1775_v35 = vrot.slane %v1767_v31, %v3111_v36 }
 0x53c   : > { %v1785_v28 = vcombine.low %v1766_v32, %v1782_v33  ;;  %v1784_v29 = vcombine.high %v1759_v34, %v1775_v35  ;;  %v1783_v39 = vcombine.low %v1759_v34, %v1775_v35  ;;  %v1786_v26 = vcombine.high %v1766_v32, %v1782_v33 }
 0x53e   : > { %1792 = vrot.lane.b32.xlu1 %v1785_v28, %s2796_s13  ;;  %1788 = vrot.lane.b32.xlu0 %v1784_v29, %s2797_s27  ;;  %v2373_v29 = vld [vmem:[%s696_s25] ss:$0 sm:$0xff] }
 0x542   : > { %1796 = vrot.lane.b32.xlu1 %v1786_v26, %s2798_s18  ;;  %v2374_v26 = vld [vmem:[%s699_s7] ss:$0 sm:$0xff] }
 0x5b0   : > { %v1793_v16 = vpop.permute.xlu1 %1792  ;;  %v1789_v15 = vpop.permute.xlu0 %1788 }
 0x5b1   : > { %v1799_v40 = vsel %vm1233_vm3, %v1783_v39, %v1789_v15 }
 0x5b2   : > { %v1801_v42 = vsel %vm1800_vm5, %v1799_v40, %v1793_v16 }
 0x5b4   : > { %v1797_v41 = vpop.permute.xlu1 %1796 }
 0x5b5   : > { %v1803_v36 = vsel %vm1802_vm6, %v1801_v42, %v1797_v41 }
 0x5b6   : > { %v1804_v43 = vpack.c.bf16 %v1803_v36, %v1803_v36 }
 0x5b8   : > { %2475 = vmatmul.mubr.msk.bf16.vlgmr.msra.gmra.mxu1 %vm735_vm2, %v1804_v43 }
 0x5b9   : > { %2494 = vmatprep.mubr.msk.bf16.mxu1 %vm2788_vm1, %v2787_v4 }
 0x678   : > { %v1865_v45 = vpop.f32.mrf.mxu1 }
 0x679   : > { %v1866_v46 = vadd.f32 %v2357_v44, %v1865_v45 }
 0x67a   : > { %v2476_v47 = vpop.f32.mrf.mxu1 }
 0x67b   : > { %v1871_v48 = vadd.f32 %v1866_v46, %v3066_v6  ;;  %v2605_v6 = vld [vmem:[%s3045_s20 + $0x18] sm:$0xff]  }
 0x67c   : > { %v1868_v49 = vpop.f32.mrf.mxu1  ;;  %2487 = vmatpush3.bf16.msra.mxu1 %v2605_v6 }
 0x67d   : > { %v1874_v37 = vsel %vm735_vm2, %v1871_v48, 0.0  ;;  %2488 = vmatprep.subr.bf16.mxu1 %v2787_v4 }
 0x67e   : > { %1875 = vadd.xlane.f32.xlu0 %v1874_v37  ;;  %v2477_v50 = vpop.f32.mrf.mxu1 }
 0x680   : > { %2489 = vmatpush3.bf16.msra.mxu1 %v2606_v57 }
 0x681   : > { %2490 = vmatprep.subr.bf16.mxu1 %v2787_v4 }
 0x684   : > { %2491 = vmatpush3.bf16.msra.mxu1 %v2607_v5 }
 0x685   : > { %2492 = vmatprep.subr.bf16.mxu1 %v2787_v4  ;;  %v2367_v4 = vld [vmem:[%s693_s30] ss:$0 sm:$0xff] }
 0x688   : > { %2493 = vmatpush3.bf16.msra.mxu1 %v2608_v7 }
 0x707   : > { %v1876_v38 = vpop.xlane.xlu0 %1875 }
 0x708   : > { %v1878_v51 = vmul.f32 0.03125, %v1876_v38 }
 0x70a   : > { %v1879_v52 = vsub.f32 %v1871_v48, %v1878_v51 }
 0x70c   : > { %v1880_v53 = vmul.f32 %v1879_v52, %v1879_v52 }
 0x70e   : > { %v1881_v54 = vsel %vm735_vm2, %v1880_v53, 0.0 }
 0x70f   : > { %1882 = vadd.xlane.f32.xlu1 %v1881_v54 }
 0x798   : > { %v1883_v58 = vpop.xlane.xlu1 %1882 }
 0x799   : > { %v1884_v59 = vmul.f32 0.03125, %v1883_v58 }
 0x79b   : > { %v1885_v60 = vadd.f32 1e-05, %v1884_v59 }
 0x79d   : > { %2625 = vrsqrt.f32 %v1885_v60 }
 0x7aa   : > { %v2626_v61 = vpop.eup %2625 }
 0x7ab   : > { %v1887_v63 = vmul.f32 %v2626_v61, %v1879_v52 }
 0x7ad   : > { %v1894_v1 = vmul.f32 %v2361_v62, %v1887_v63 }
 0x7af   : > { %v1901_v2 = vadd.f32 %v2362_v0, %v1894_v1 }
 0x7b1   : > { %v1902_v3 = vpack.c.bf16 %v1901_v2, %v1901_v2 }
 0x7b3   : > { %2483 = vmatmul.mubr.msk.bf16.vlgmr.msra.gmra.mxu0 %vm735_vm2, %v1902_v3 }
 0x873   : > { %v1963_v9 = vpop.f32.mrf.mxu0 }
 0x874   : > { %v1964_v11 = vadd.f32 %v2363_v8, %v1963_v9 }
 0x875   : > { %v2484_v12 = vpop.f32.mrf.mxu0 }
 0x876   : > { %v1969_v13 = vmax.f32 %v1964_v11, 0.0 }
 0x877   : > { %v1966_v17 = vpop.f32.mrf.mxu0 }
 0x878   : > { %v1970_v18 = vpack.c.bf16 %v1969_v13, %v1969_v13 }
 0x879   : > { %v2485_v19 = vpop.f32.mrf.mxu0 }
 0x87a   : > { %2495 = vmatmul.mubr.msk.bf16.vlgmr.msra.gmra.mxu1 %vm2010_vm7, %v1970_v18 }
 0x93a   : > { %v2048_v20 = vpop.f32.mrf.mxu1 }
 0x93b   : > { %v2049_v21 = vadd.f32 %v2367_v4, %v2048_v20 }
 0x93c   : > { %v2496_v22 = vpop.f32.mrf.mxu1 }
 0x93d   : > { %v2054_v23 = vadd.f32 %v2049_v21, %v1901_v2 }
 0x93e   : > { %v2051_v24 = vpop.f32.mrf.mxu1 }
 0x93f   : > { %v2057_v25 = vsel %vm735_vm2, %v2054_v23, 0.0 }
 0x940   : > { %2058 = vadd.xlane.f32.xlu0 %v2057_v25  ;;  %v2497_v27 = vpop.f32.mrf.mxu1 }
 0x9c9   : > { %v2059_v30 = vpop.xlane.xlu0 %2058 }
 0x9ca   : > { %v2060_v14 = vmul.f32 0.03125, %v2059_v30 }
 0x9cc   : > { %v2061_v10 = vsub.f32 %v2054_v23, %v2060_v14 }
 0x9ce   : > { %v2062_v31 = vmul.f32 %v2061_v10, %v2061_v10 }
 0x9d0   : > { %v2063_v32 = vsel %vm735_vm2, %v2062_v31, 0.0 }
 0x9d1   : > { %2064 = vadd.xlane.f32.xlu0 %v2063_v32 }
 0xa5a   : > { %v2065_v33 = vpop.xlane.xlu0 %2064 }
 0xa5b   : > { %v2066_v34 = vmul.f32 0.03125, %v2065_v33 }
 0xa5d   : > { %v2067_v35 = vadd.f32 1e-05, %v2066_v34 }
 0xa5f   : > { %2627 = vrsqrt.f32 %v2067_v35 }
 0xa6c   : > { %v2628_v28 = vpop.eup %2627 }
 0xa6d   : > { %v2069_v39 = vmul.f32 %v2628_v28, %v2061_v10 }
 0xa6f   : > { %v2076_v16 = vmul.f32 %v2373_v29, %v2069_v39  ;;  %2088 = sbr.rel (%p2375_p4) target bundleno = 2677 (0xa75), region = 92 }
 0xa71   : > { %v2083_v15 = vadd.f32 %v2374_v26, %v2076_v16 }
 0xa73   : > { %2084 = vst.msk [vmem:[#allocation2] sm:$0xff] %vm735_vm2, %v2083_v15 }
 0xa74   : > { %2089 = vst.msk [vmem:[%s3059_s17] sm:$0xff] %vm735_vm2, %v2083_v15 }
 0xa75 PF: > { %s3428_s18 = sld [smem:[#allocation15_spill]]  ;;  %s2104_s19 = sshll.u32 %s3059_s17, 4  ;;  %s2105_s19 = int_to_ptr.vmem [resolvable:$true] %s2104_s19 }
 0xa76   : > { %s3429_s25 = sld [smem:[#allocation24_spill]]  ;;  %s2683_s12 = scalar_lea.vmem %s2105_s19, 128 }
 0xa77   : > { %s3430_s1 = sld [smem:[#allocation21_spill]]  ;;  %p2684_p12 = scmp.ne.s32.totalorder %s2105_s19, %s2683_s12 }
 0xa78   : > { %s3431_s10 = sld [smem:[#allocation35_spill]]  ;;  %s2799_s16 = smov [#allocation8]  }
 0xa79   : > { %s2687_s14 = sshll.u32 %s2799_s16, 4  ;;  %s2688_s14 = int_to_ptr.vmem [resolvable:$false] %s2687_s14 }
 0xa7a   : > { %s2689_s4 = scalar_lea.vmem %s2688_s14, 256  ;;  %p2690_p5 = scmp.lt.s32.totalorder %s2105_s19, %s2688_s14 }
 0xa7b   : > { %s2377_s26 = sshll.u32 %s3428_s18, 7  ;;  %p2691_p7 = scmp.lt.s32.totalorder %s2689_s4, %s2683_s12 }
 0xa7c   : > { %s2091_s23 = scalar_lea.sflag [#allocation5], %s3429_s25 }
 0xa7d   : > { %p3432_p0 = scmp.ne.s32.totalorder %s3430_s1, 0  ;;  %p2692_p9 = por %p2691_p7, %p2690_p5 }
 0xa7e   : > { %s2102_s7 = scalar_lea.hbm %s3431_s10, %s2377_s26 }
 0xa7f   : > { %p2685_p3 = pnand %p2684_p12, %p3432_p0 }
 0xa81   : > { %p2686_p2 = pneg %p2685_p3 }
 0xa83   : > { %p2693_p6 = pnand %p2692_p9, %p2686_p2 }
 0xa85   : > { %2696 = shalt.err (!%p2693_p6)
}
 0xa86   : > { %s2697_s8 = scalar_lea.hbm %s2102_s7, 128  ;;  %s2701_s29 = scalar_lea.hbm %s3431_s10, 256 }
 0xa87   : > { %p2698_p11 = scmp.ne.s32.totalorder %s2102_s7, %s2697_s8  ;;  %p2702_p8 = scmp.lt.s32.totalorder %s2102_s7, %s3431_s10 }
 0xa88   : > { %p2703_p1 = scmp.lt.s32.totalorder %s2701_s29, %s2697_s8 }
 0xa89   : > { %p2699_p13 = pnand %p2698_p11, %p3432_p0 }
 0xa8a   : > { %p2704_p4 = por %p2703_p1, %p2702_p8 }
 0xa8b   : > { %p2700_p10 = pneg %p2699_p13 }
 0xa8d   : > { %p2705_p12 = pnand %p2704_p4, %p2700_p10 }
 0xa8f   : > { %2708 = shalt.err (!%p2705_p12)
}
 0xa90   : > { %2504 = dma.vmem_to_hbm [thread:$0]  (%p3432_p0), %s2105_s19, 128, %s2102_s7, %s2091_s23  }
 0xa91 PF: > { %s3433_s21 = sld [smem:[#allocation18_spill]] }
 0xa92   : > { %s3434_s2 = sld [smem:[#allocation12_spill]] }
 0xa93   : > { %s3435_s20 = sld [smem:[#allocation19_spill]] }
 0xa97   : > { %p2521_p3 = scmp.ge.s32.totalorder %s3433_s21, 2 }
 0xa98   : > { %s2116_s30 = sand.u32 1, %s3434_s2  }
 0xa99   : > { %p3436_p2 = scmp.ne.s32.totalorder %s3435_s20, 0  ;;  %s2117_s0 = scalar_lea.sflag [#allocation5], %s2116_s30 }
 0xa9b   : > { %p2515_p5 = pnand %p2521_p3, %p3436_p2 }
 0xa9d   : > { %p2516_p7 = pneg %p2515_p5 }
 0xa9f   : > { %2750 = dma.done.wait (%p2516_p7), %s2117_s0, 128  }
 0xaa0   : > { %2752 = vsyncadd (%p2516_p7), %s2117_s0, 4294967168  ;;  %s31_s20 = sadd.s32 1, %s3433_s21   ;;  %s3437_s29 = sld [smem:[#allocation13_spill]] }
 0xaa1   : > { %p28_p9 = scmp.ge.s32.totalorder %s31_s20, 6   ;;  %s3438_s30 = sld [smem:[#allocation14_spill]] }
 0xaa2   : > { %s3439_s15 = sld [smem:[#allocation23_spill]] }
 0xaa3   : > { %s3440_s16 = sld [smem:[#allocation16_spill]]  ;;  %30 = sbr.rel (!%p28_p9) target bundleno = 20 (0x14), region = 170 }
 0xaa4   : > { %s3441_s17 = sld [smem:[#allocation17_spill]] }
 0xaa5   : > { %s3442_s18 = sld [smem:[#allocation20_spill]] }
 0xaa6   : > { %s3443_s19 = sld [smem:[#allocation22_spill]] }
 0xaa8   :  { %2122 = vsyncpa [#allocation4], 1 }
 0xaa9   :  { %2124 = vsyncpa [#allocation4 + $0x1], 1 }
 0xaaa   :  { %2125 = vsyncpa [#allocation7], 1 }
 0xaab   :  { %2127 = vsyncpa [#allocation7 + $0x1], 1 }
 0xaac   :  { %2128 = vsyncpa [#allocation5], 1 }
 0xaad   :  { %2130 = vsyncpa [#allocation5 + $0x1], 1 }

</bundles_post_ra>
